<compile_context>
chip_gen: v5e
topology: v5e:2x2
jax: 0.10.0
libtpu: 0.0.40
codegen_flags: <defaults>
</compile_context>

<pallas_src>
import jax
import jax.numpy as jnp
from jax.experimental import pallas as pl
from jax.experimental.pallas import tpu as pltpu

_LANE = 128
_MAX_BLOCK_ROWS = 1024  # 1024 x 128 x 4B = 512 KiB per f32 block


def _make_kernel(block_rows, rows, nblocks, blocks_per_core, needs_row_mask):
    """Build the kernel with all shape parameters bound statically."""

    def kernel(x_ref, relu_ref, pmax_ref):
        c = pl.program_id(0)   # core / parallel axis
        j = pl.program_id(1)   # sequential block axis within a core

        x = x_ref[...]                                     # (block_rows, 128)

        # Elementwise ReLU in the native dtype (no zeros tile materialized).
        relu_ref[...] = jnp.maximum(x, 0).astype(relu_ref.dtype)

        # |x| in native dtype; only cast the tiny reduced partial to f32.
        xa = jnp.abs(x)
        if needs_row_mask:
            # Last block may hang past the valid rows: mask OOB rows to 0
            # (|x| >= 0, so 0 never wins the max).
            blk = jnp.minimum(c * blocks_per_core + j, nblocks - 1)
            row_ids = (
                jax.lax.broadcasted_iota(jnp.int32, (block_rows, _LANE), 0)
                + blk * block_rows
            )
            xa = jnp.where(row_ids < rows, xa, jnp.zeros_like(xa))

        # Mostly-VPU fold across rows; one small in-vreg reduce per big block.
        part = jnp.max(xa, axis=0, keepdims=True).astype(jnp.float32)  # (1,128)

        # Per-core resident accumulator lives in the output block itself.
        @pl.when(j == 0)
        def _():
            pmax_ref[...] = jnp.zeros_like(pmax_ref)

        pmax_ref[...] = jnp.maximum(pmax_ref[...], part.reshape(1, 1, _LANE))

    return kernel


def scale_tracking_relu(x, max_buf, *, max_block_rows=_MAX_BLOCK_ROWS):
    """Returns (relu(x), new_max) where new_max = maximum(max_buf, max(|x|))."""
    orig_shape = x.shape
    orig_dtype = x.dtype

    flat = x.reshape(-1)
    n = flat.shape[0]

    # Fast path: reshape only (no copy). Pad only if not 128-aligned (rare).
    padded = (n % _LANE) != 0
    if padded:
        n_pad = pl.cdiv(n, _LANE) * _LANE
        flat = jnp.pad(flat, (0, n_pad - n))  # zeros are safe for relu & max(|x|)
    rows = flat.shape[0] // _LANE
    x2d = flat.reshape(rows, _LANE)

    block_rows = min(max_block_rows, rows)          # == rows (full dim) if small
    nblocks = pl.cdiv(rows, block_rows)
    ncores = 2 if nblocks >= 2 else 1               # megacore split (v7x); loop elsewhere
    blocks_per_core = pl.cdiv(nblocks, ncores)
    needs_row_mask = (rows % block_rows) != 0

    def blk_idx(c, j):
        # Clamp overflow steps (odd nblocks) to the last block; it is then
        # recomputed with identical results -> idempotent, and always stays
        # within the owning core's range for nblocks >= 2.
        return jnp.minimum(c * blocks_per_core + j, nblocks - 1)

    kernel = _make_kernel(block_rows, rows, nblocks, blocks_per_core, needs_row_mask)

    relu2d, pmax = pl.pallas_call(
        kernel,
        out_shape=(
            jax.ShapeDtypeStruct((rows, _LANE), orig_dtype),
            jax.ShapeDtypeStruct((ncores, 1, _LANE), jnp.float32),
        ),
        grid_spec=pltpu.PrefetchScalarGridSpec(
            num_scalar_prefetch=0,
            grid=(ncores, blocks_per_core),
            in_specs=[
                pl.BlockSpec((block_rows, _LANE), lambda c, j: (blk_idx(c, j), 0)),
            ],
            out_specs=(
                pl.BlockSpec((block_rows, _LANE), lambda c, j: (blk_idx(c, j), 0)),
                pl.BlockSpec((1, 1, _LANE), lambda c, j: (c, 0, 0)),  # per-core resident
            ),
        ),
        compiler_params=pltpu.CompilerParams(
            dimension_semantics=("parallel", "arbitrary"),
        ),
    )(x2d)

    relu_flat = relu2d.reshape(-1)
    if padded:
        relu_flat = relu_flat[:n]
    relu_out = relu_flat.reshape(orig_shape)

    # Fold per-core partials + running buffer on <= ncores*128 floats.
    new_max = jnp.maximum(jnp.asarray(max_buf, jnp.float32), jnp.max(pmax))
    return relu_out, new_max
    # TODO(synk): the torch module mutates self.max in-place (and train() resets
    # it); here the updated buffer is returned functionally for the caller to carry.


if __name__ == "__main__":
    key = jax.random.PRNGKey(0)

    # NCHW activations, as a conv layer would feed this module.
    x = jax.random.normal(key, (2, 4, 16, 16), dtype=jnp.float32) * 3.0
    max_buf = jnp.ones((), jnp.float32)  # torch buffer init: ones(())

    relu_out, new_max = scale_tracking_relu(x, max_buf)
    relu_out = jax.block_until_ready(relu_out)
    new_max = jax.block_until_ready(new_max)

    ref_relu = jnp.maximum(x, 0.0)
    ref_max = jnp.maximum(max_buf, jnp.max(jnp.abs(x)))
    assert relu_out.shape == x.shape and relu_out.dtype == x.dtype
    assert jnp.allclose(relu_out, ref_relu)
    assert jnp.allclose(new_max, ref_max)

    # Second check exercises the multi-block / two-core / clamped-overflow /
    # ragged-last-block paths (rows = 2304 -> 3 blocks of 1024, 2 "cores").
    x2 = jax.random.normal(jax.random.PRNGKey(1), (4, 32, 48, 48), jnp.float32) * 2.0
    r2, m2 = scale_tracking_relu(x2, max_buf)
    r2 = jax.block_until_ready(r2)
    m2 = jax.block_until_ready(m2)
    assert jnp.allclose(r2, jnp.maximum(x2, 0.0))
    assert jnp.allclose(m2, jnp.maximum(max_buf, jnp.max(jnp.abs(x2))))

    print("KERNEL_OK")
</pallas_src>

<mosaic_0001>
module attributes {stable_mosaic.version = 11 : i64} {
  func.func @kernel(%arg0: i32, %arg1: i32, %arg2: memref<16x128xf32, #tpu.memory_space<vmem>>, %arg3: memref<16x128xf32, #tpu.memory_space<vmem>>, %arg4: memref<1x1x128xf32, #tpu.memory_space<vmem>>) attributes {dimension_semantics = [#tpu.dimension_semantics<parallel>, #tpu.dimension_semantics<arbitrary>], iteration_bounds = array<i64: 1, 1>, scalar_prefetch = 0 : i64, scratch_operands = 0 : i64, tpu.core_type = #tpu.core_type<tc>, window_params = [{transform_indices = @transform_0, window_bounds = array<i64: 16, 128>}, {transform_indices = @transform_1, window_bounds = array<i64: 16, 128>}, {transform_indices = @transform_2, window_bounds = array<i64: 1, 1, 128>}]} {
    %c0 = arith.constant 0 : index
    %c0_0 = arith.constant 0 : index
    %0 = vector.load %arg2[%c0, %c0_0] : memref<16x128xf32, #tpu.memory_space<vmem>>, vector<16x128xf32>
    %cst = arith.constant 0.000000e+00 : f32
    %1 = vector.broadcast %cst : f32 to vector<16x128xf32>
    %2 = arith.maximumf %0, %1 : vector<16x128xf32>
    %c0_1 = arith.constant 0 : index
    %c0_2 = arith.constant 0 : index
    %3 = vector.load %arg3[%c0_1, %c0_2] : memref<16x128xf32, #tpu.memory_space<vmem>>, vector<16x128xf32>
    tpu.vector_store %arg3[%c0_1, %c0_2], %2 {strides = array<i32>} : memref<16x128xf32, #tpu.memory_space<vmem>>, vector<16x128xf32>,
    %4 = math.absf %0 : vector<16x128xf32>
    %cst_3 = arith.constant dense<0xFF800000> : vector<128xf32>
    %5 = vector.multi_reduction <maximumf>, %4, %cst_3 [0] : vector<16x128xf32> to vector<128xf32>
    %6 = vector.shape_cast %5 : vector<128xf32> to vector<1x128xf32>
    %c0_i32 = arith.constant 0 : i32
    %7 = arith.cmpi eq, %arg1, %c0_i32 : i32
    %8 = arith.extui %7 : i1 to i32
    %c0_i32_4 = arith.constant 0 : i32
    %9 = arith.cmpi ne, %8, %c0_i32_4 : i32
    scf.if %9 {
      %cst_11 = arith.constant 0.000000e+00 : f32
      %14 = vector.broadcast %cst_11 : f32 to vector<1x1x128xf32>
      %c0_12 = arith.constant 0 : index
      %c0_13 = arith.constant 0 : index
      %c0_14 = arith.constant 0 : index
      %15 = vector.load %arg4[%c0_12, %c0_13, %c0_14] : memref<1x1x128xf32, #tpu.memory_space<vmem>>, vector<1x1x128xf32>
      tpu.vector_store %arg4[%c0_12, %c0_13, %c0_14], %14 {strides = array<i32>} : memref<1x1x128xf32, #tpu.memory_space<vmem>>, vector<1x1x128xf32>,
    } else {
    }
    %c0_5 = arith.constant 0 : index
    %c0_6 = arith.constant 0 : index
    %c0_7 = arith.constant 0 : index
    %10 = vector.load %arg4[%c0_5, %c0_6, %c0_7] : memref<1x1x128xf32, #tpu.memory_space<vmem>>, vector<1x1x128xf32>
    %11 = vector.shape_cast %6 : vector<1x128xf32> to vector<1x1x128xf32>
    %12 = arith.maximumf %10, %11 : vector<1x1x128xf32>
    %c0_8 = arith.constant 0 : index
    %c0_9 = arith.constant 0 : index
    %c0_10 = arith.constant 0 : index
    %13 = vector.load %arg4[%c0_8, %c0_9, %c0_10] : memref<1x1x128xf32, #tpu.memory_space<vmem>>, vector<1x1x128xf32>
    tpu.vector_store %arg4[%c0_8, %c0_9, %c0_10], %12 {strides = array<i32>} : memref<1x1x128xf32, #tpu.memory_space<vmem>>, vector<1x1x128xf32>,
    return
  }
  func.func @transform_0(%arg0: i32, %arg1: i32) -> (i32, i32) {
    %c1_i32 = arith.constant 1 : i32
    %0 = arith.muli %arg0, %c1_i32 : i32
    %1 = arith.addi %0, %arg1 : i32
    %c0_i32 = arith.constant 0 : i32
    %2 = arith.minsi %1, %c0_i32 : i32
    %c0_i32_0 = arith.constant 0 : i32
    %c0_i32_1 = arith.constant 0 : i32
    return %2, %c0_i32_0 : i32, i32
  }
  func.func @transform_1(%arg0: i32, %arg1: i32) -> (i32, i32) {
    %c1_i32 = arith.constant 1 : i32
    %0 = arith.muli %arg0, %c1_i32 : i32
    %1 = arith.addi %0, %arg1 : i32
    %c0_i32 = arith.constant 0 : i32
    %2 = arith.minsi %1, %c0_i32 : i32
    %c0_i32_0 = arith.constant 0 : i32
    %c0_i32_1 = arith.constant 0 : i32
    return %2, %c0_i32_0 : i32, i32
  }
  func.func @transform_2(%arg0: i32, %arg1: i32) -> (i32, i32, i32) {
    %c0_i32 = arith.constant 0 : i32
    %c0_i32_0 = arith.constant 0 : i32
    %c0_i32_1 = arith.constant 0 : i32
    return %arg0, %c0_i32, %c0_i32_0 : i32, i32, i32
  }
}

</mosaic_0001>

<bundles_post_ra>
// kernel: tpu_custom_call.1
= control target key start
LH: loop header
LB: loop body
LE: loop exit
PB: predicated region body
PF: predicated region fallthrough
CT: control target
= control target key end

     0   :  { %8 = vsyncpa [#allocation3], 0  ;;  %s224_s0 = inlined_call_operand.hbm [shape: f32[16,128], index: 0, kind: input, shape index: {}]   ;;  %s225_s1 = inlined_call_operand.hbm [shape: f32[16,128], index: 1, kind: output, shape index: {0}]   ;;  %s226_s2 = inlined_call_operand.hbm [shape: f32[1,1,128], index: 2, kind: output, shape index: {1}]  }
   0x1   :  { %9 = vsyncpa [#allocation4], 0 }
   0x2   :  { %10 = vsyncpa [#allocation7], 0  ;;  %s21_s11 = sshll.u32 %s224_s0, 4  ;;  %s194_s12 = smov [#allocation2]   ;;  %s22_s11 = int_to_ptr.hbm [resolvable:$true] %s21_s11 }
   0x3   :  { %s23_s13 = sshll.u32 %s194_s12, 4  ;;  %s195_s14 = smov 128   ;;  %s24_s13 = int_to_ptr.vmem [resolvable:$true] %s23_s13 }
   0x4   :  { %s196_s15 = smov 8  }
   0x5   :  { %29 = dma.hbm_to_vmem [thread:$0]  %s22_s11, 256, %s24_s13, [#allocation3], %s195_s14, %s195_s14, %s196_s15  }
   0x6   :  { %188 = dma.done.wait [#allocation3], 256  }
   0x7   :  { %189 = vsyncadd [#allocation3], 4294967040  ;;  %v197_v0 = vmov 0.0   ;;  %s198_s16 = smov [#allocation5]   ;;  %s77_s20 = sshll.u32 %s225_s1, 4  ;;  %v42_v1 = vld [vmem:[#allocation2] sm:$0xff]  ;;  %s78_s20 = int_to_ptr.hbm [resolvable:$true] %s77_s20 }
   0x8   :  { %61 = vst [vmem:[#allocation6] sm:$0x1] %v197_v0  ;;  %s75_s17 = sshll.u32 %s198_s16, 4  ;;  %v43_v2 = vld [vmem:[#allocation2 + $0x8] sm:$0xff]  ;;  %v44_v3 = vmax.f32 %v42_v1, 0.0  ;;  %s199_s0 = smov [#allocation6]   ;;  %s76_s17 = int_to_ptr.vmem [resolvable:$true] %s75_s17 }
   0x9   :  { %v48_v4 = vand.u32 2147483647, %v42_v1  ;;  %v45_v5 = vmax.f32 %v43_v2, 0.0  ;;  %v49_v6 = vand.u32 2147483647, %v43_v2  ;;  %s89_s1 = sshll.u32 %s199_s0, 4  ;;  %s90_s1 = int_to_ptr.vmem [resolvable:$true] %s89_s1 }
   0xa   :  { %46 = vst [vmem:[#allocation5] sm:$0xff] %v44_v3  ;;  %s91_s23 = sshll.u32 %s226_s2, 4  ;;  %s92_s23 = int_to_ptr.hbm [resolvable:$true] %s91_s23 }
   0xb   :  { %v50_v7 = vmax.f32 %v48_v4, %v49_v6  ;;  %47 = vst [vmem:[#allocation5 + $0x8] sm:$0xff] %v45_v5 }
   0xc   :  { %83 = dma.vmem_to_hbm [thread:$0]  %s76_s17, 256, %s78_s20, [#allocation4], %s195_s14, %s195_s14, %s196_s15  }
   0xd   :  { %v51_v8 = vrot.slane %v50_v7, 4 }
   0xf   :  { %v52_v9 = vmax.f32 %v50_v7, %v51_v8  ;;  %v62_v13 = vld [vmem:[#allocation6] sm:$0x1] }
  0x11   :  { %v53_v10 = vrot.slane %v52_v9, 2 }
  0x13   :  { %v54_v11 = vmax.f32 %v52_v9, %v53_v10 }
  0x15   :  { %v55_v12 = vrot.slane %v54_v11, 1 }
  0x17   :  { %v56_v14 = vmax.f32 %v54_v11, %v55_v12 }
  0x19   :  { %v63_v15 = vmax.f32 %v62_v13, %v56_v14 }
  0x1b   :  { %64 = vst [vmem:[#allocation6] sm:$0x1] %v63_v15 }
  0x1c   :  { %94 = dma.vmem_to_hbm [thread:$0]  %s90_s1, 16, %s92_s23, [#allocation7]  }
  0x1d   :  { %190 = dma.done.wait [#allocation4], 256  }
  0x1e   :  { %191 = vsyncadd [#allocation4], 4294967040 }
  0x1f   :  { %192 = dma.done.wait [#allocation7], 16  }
  0x20   :  { %193 = vsyncadd [#allocation7], 4294967280 }
  0x21   :  { %103 = vsyncpa [#allocation3], 1 }
  0x22   :  { %104 = vsyncpa [#allocation4], 1 }
  0x23   :  { %105 = vsyncpa [#allocation7], 1 }

</bundles_post_ra>
